<compile_context>
chip_gen: v6e
topology: v6e:2x2x1
jax: 0.10.0
libtpu: 0.0.40
codegen_flags: <defaults>
</compile_context>

<pallas_src>
import functools

import jax
import jax.numpy as jnp
from jax.experimental import pallas as pl
from jax.experimental.pallas import tpu as pltpu


def _vmem_limit_bytes():
    """Generation-aware VMEM limit (~40 MiB on v7x, ~80 MiB on v5e/v6e)."""
    cap = 64 * 1024 * 1024  # conservative default if the query is unavailable
    try:
        info = pltpu.get_tpu_info()
        cap = int(getattr(info, "vmem_capacity_bytes", cap) or cap)
    except Exception:
        pass
    return int(min(cap * 5 // 8, 96 * 1024 * 1024))


def _pick_ho_block(n, ho, wo, c, o, k, s, in_itemsize, out_itemsize, budget):
    """Largest legal Ho-block whose double-buffered tiles fit the VMEM budget.

    Legality: input block second-minor (hb) must be a multiple of 8 (or the
    full extent) and the flattened output lanes (hb*Wo) a multiple of 128 (or
    the full extent).  Prefers divisors of Ho (no masked tail tile) and keeps
    >= 2 grid steps when batch == 1 (v7x megacore load balance).
    """

    def legal(hb):
        if hb == ho:
            return True
        return hb % 8 == 0 and (hb * wo) % 128 == 0

    def fits(hb):
        in_blk = c * hb * s * s * wo * in_itemsize     # input tile (x2 buffered)
        out_blk = o * hb * wo * out_itemsize           # output tile (x2 buffered)
        rhs = k * hb * wo * 2                          # bf16 RHS scratch
        work = 2 * in_blk                              # bf16 copy + shuffle temps
        return 2 * in_blk + 2 * out_blk + rhs + work <= budget

    def cdiv(a, b):
        return -(-a // b)

    cands = sorted({hb for hb in range(8, min(ho, 64) + 1, 8)} | {ho})
    legal_c = [hb for hb in cands if hb <= ho and legal(hb)]
    ok = [hb for hb in legal_c if fits(hb)]
    if not ok:
        # TODO(synk): add K/O tiling instead of relying on vmem_limit headroom
        # when even the minimal legal block exceeds the budget (very large C).
        return min(legal_c) if legal_c else ho

    div = [hb for hb in ok if ho % hb == 0]
    pick = max(div) if div else max(ok)
    if n == 1 and cdiv(ho, pick) < 2:          # keep both v7x TensorCores busy
        smaller = [hb for hb in ok if cdiv(ho, hb) >= 2]
        if smaller:
            sd = [hb for hb in smaller if ho % hb == 0]
            pick = max(sd) if sd else max(smaller)
    return pick


@functools.partial(jax.jit, static_argnames=("stride", "out_dtype"))
def patch_merging_forward(x_nchw, weight, stride=2, out_dtype=None):
    """Equivalent of PatchMerging.forward (conv_op=nn.Conv2d, norm_layer=None).

    x_nchw : (N, C, H, W)
    weight : (O, C, s, s)   PyTorch conv weight layout, bias=False
    returns: (N, O, H//s, W//s) in out_dtype (default: x dtype)
    """
    if isinstance(stride, (tuple, list)):
        s = int(stride[0])
        assert all(int(v) == s for v in stride), "TODO(synk): anisotropic strides"
    else:
        s = int(stride)

    N, C, H, W = x_nchw.shape
    O = weight.shape[0]
    Ho, Wo = H // s, W // s
    assert Ho > 0 and Wo > 0
    Wc = Wo * s
    K = C * s * s
    out_dtype = x_nchw.dtype if out_dtype is None else out_dtype

    # Conv floor semantics when H/W are not multiples of the stride.
    x_nchw = x_nchw[:, :, : Ho * s, : Wo * s]
    # Free reshape: each "Ho row" holds the s input rows (ho*s .. ho*s+s-1)
    # concatenated along the lane axis.  No HBM rearrangement pass.
    xv = x_nchw.reshape(N, C, Ho, s * Wc)

    # Conv weight (O, C, kh, kw) -> (O, K) with K ordered (kh, kw, c) to match
    # the in-kernel RHS phase layout.
    w_mat = weight.transpose(0, 2, 3, 1).reshape(O, K).astype(jnp.bfloat16)

    # One-hot "perfect shuffle": lane (wo*s + sj) of an input row maps to lane
    # (sj*Wo + wo).  Selection via MXU matmul is exact for bf16 operands.
    col = jnp.arange(Wc)
    tgt = (col % s) * Wo + (col // s)
    e_mat = (tgt[:, None] == jnp.arange(s * Wo)[None, :]).astype(jnp.bfloat16)

    in_itemsize = jnp.dtype(x_nchw.dtype).itemsize
    out_itemsize = jnp.dtype(out_dtype).itemsize
    vmem_limit = _vmem_limit_bytes()
    const_bytes = O * K * 2 + Wc * s * Wo * 2            # single-buffered constants
    budget = max(vmem_limit - const_bytes - 6 * 1024 * 1024, 2 * 1024 * 1024)
    hb = _pick_ho_block(N, Ho, Wo, C, O, K, s, in_itemsize, out_itemsize, budget)
    sblk = hb * Wo
    grid = (N, pl.cdiv(Ho, hb))

    def kernel(x_ref, w_ref, e_ref, o_ref, rhs_ref):
        e = e_ref[...]                                    # (Wc, s*Wo) bf16 one-hot
        v = x_ref[0].astype(jnp.bfloat16)                 # (C, hb, s*Wc)
        v2 = v.reshape(C * hb, s * Wc)                    # tile-preserving merge
        for r in range(s):                                # row phase: contiguous lanes
            rows = v2[:, r * Wc:(r + 1) * Wc]             # (C*hb, Wc)
            sel = jnp.dot(rows, e, preferred_element_type=jnp.float32)
            sel = sel.astype(jnp.bfloat16).reshape(C, hb, s * Wo)
            for sj in range(s):                           # column phase blocks
                p = r * s + sj
                blk = sel[:, :, sj * Wo:(sj + 1) * Wo]    # (C, hb, Wo)
                for h in range(hb):                       # ho -> lanes via scratch stores
                    rhs_ref[p * C:(p + 1) * C, h * Wo:(h + 1) * Wo] = blk[:, h, :]
        # One weight-stationary MXU matmul streaming S = hb*Wo lanes.
        acc = jnp.dot(w_ref[...], rhs_ref[...], preferred_element_type=jnp.float32)
        o_ref[0] = acc.astype(o_ref.dtype)

    flops_main = 2 * N * Ho * Wo * K * O
    flops_sel = 2 * N * s * (C * Ho) * Wc * (s * Wo)
    bytes_accessed = (
        N * C * Ho * s * Wc * in_itemsize
        + O * K * 2
        + Wc * s * Wo * 2
        + N * O * Ho * Wo * out_itemsize
    )
    cost = pl.CostEstimate(
        flops=int(flops_main + flops_sel),
        transcendentals=0,
        bytes_accessed=int(bytes_accessed),
    )

    out3 = pl.pallas_call(
        kernel,
        out_shape=jax.ShapeDtypeStruct((N, O, Ho * Wo), out_dtype),
        grid_spec=pltpu.PrefetchScalarGridSpec(
            num_scalar_prefetch=0,
            grid=grid,
            in_specs=[
                pl.BlockSpec((1, C, hb, s * Wc), lambda n, h: (n, 0, h, 0)),
                pl.BlockSpec((O, K), lambda n, h: (0, 0),
                             pipeline_mode=pl.Buffered(1)),
                pl.BlockSpec((Wc, s * Wo), lambda n, h: (0, 0),
                             pipeline_mode=pl.Buffered(1)),
            ],
            out_specs=pl.BlockSpec((1, O, sblk), lambda n, h: (n, 0, h)),
            scratch_shapes=[pltpu.VMEM((K, sblk), jnp.bfloat16)],
        ),
        compiler_params=pltpu.CompilerParams(
            dimension_semantics=("parallel", "parallel"),
            vmem_limit_bytes=vmem_limit,
        ),
        cost_estimate=cost,
    )(xv, w_mat, e_mat)

    # (N, O, Ho*Wo) -> (N, O, Ho, Wo): free reshape, no transpose.
    return out3.reshape(N, O, Ho, Wo)


if __name__ == "__main__":
    key = jax.random.PRNGKey(0)
    k_x, k_w = jax.random.split(key)

    N, C, H, W = 2, 8, 16, 16
    out_dim, stride = 16, 2

    x = jax.random.normal(k_x, (N, C, H, W), dtype=jnp.float32)
    weight = (
        jax.random.normal(k_w, (out_dim, C, stride, stride), dtype=jnp.float32) * 0.1
    )

    y = patch_merging_forward(x, weight, stride=stride)
    y = jax.block_until_ready(y)

    # Reference: XLA conv on the same bf16-rounded operands (the kernel feeds
    # the MXU bf16 operands with f32 accumulation).
    xq = x.astype(jnp.bfloat16).astype(jnp.float32)
    wq = weight.astype(jnp.bfloat16).astype(jnp.float32)
    y_ref = jax.lax.conv_general_dilated(
        xq,
        wq,
        window_strides=(stride, stride),
        padding="VALID",
        dimension_numbers=("NCHW", "OIHW", "NCHW"),
        precision=jax.lax.Precision.HIGHEST,
        preferred_element_type=jnp.float32,
    )
    assert y.shape == (N, out_dim, H // stride, W // stride), y.shape
    err = float(jnp.max(jnp.abs(y - y_ref)))
    assert jnp.allclose(y, y_ref, atol=1e-3, rtol=1e-3), err

    print("KERNEL_OK")
</pallas_src>

<mosaic_0001>
module attributes {stable_mosaic.version = 11 : i64} {
  func.func @kernel(%arg0: i32, %arg1: i32, %arg2: memref<1x8x8x32xf32, #tpu.memory_space<vmem>>, %arg3: memref<16x32xbf16, #tpu.memory_space<vmem>>, %arg4: memref<16x16xbf16, #tpu.memory_space<vmem>>, %arg5: memref<1x16x64xf32, #tpu.memory_space<vmem>>, %arg6: memref<32x64xbf16, #tpu.memory_space<vmem>>) attributes {dimension_semantics = [#tpu.dimension_semantics<parallel>, #tpu.dimension_semantics<parallel>], iteration_bounds = array<i64: 2, 1>, scalar_prefetch = 0 : i64, scratch_operands = 1 : i64, tpu.core_type = #tpu.core_type<tc>, window_params = [{transform_indices = @transform_0, window_bounds = array<i64: 1, 8, 8, 32>}, {pipeline_mode = #tpu.pipeline_mode<synchronous>, transform_indices = @transform_1, window_bounds = array<i64: 16, 32>}, {pipeline_mode = #tpu.pipeline_mode<synchronous>, transform_indices = @transform_2, window_bounds = array<i64: 16, 16>}, {transform_indices = @transform_3, window_bounds = array<i64: 1, 16, 64>}]} {
    %c0 = arith.constant 0 : index
    %c0_0 = arith.constant 0 : index
    %0 = vector.load %arg4[%c0, %c0_0] : memref<16x16xbf16, #tpu.memory_space<vmem>>, vector<16x16xbf16>
    %c0_1 = arith.constant 0 : index
    %c0_2 = arith.constant 0 : index
    %c0_3 = arith.constant 0 : index
    %c0_4 = arith.constant 0 : index
    %1 = vector.load %arg2[%c0_1, %c0_2, %c0_3, %c0_4] : memref<1x8x8x32xf32, #tpu.memory_space<vmem>>, vector<1x8x8x32xf32>
    %2 = vector.shape_cast %1 : vector<1x8x8x32xf32> to vector<8x8x32xf32>
    %3 = arith.truncf %2 : vector<8x8x32xf32> to vector<8x8x32xbf16>
    %4 = vector.shape_cast %3 : vector<8x8x32xbf16> to vector<64x32xbf16>
    %5 = vector.extract_strided_slice %4 {offsets = [0, 0], sizes = [64, 16], strides = [1, 1]} : vector<64x32xbf16> to vector<64x16xbf16>
    %cst = arith.constant dense<0.000000e+00> : vector<64x16xf32>
    %6 = tpu.matmul %5, %0, %cst {dimension_numbers = #tpu.dot_dimension_numbers<[1], [0], [0], [1], [0, 0, 1, 1], [], []>} : vector<64x16xbf16>, vector<16x16xbf16>, vector<64x16xf32> -> vector<64x16xf32>
    %7 = arith.truncf %6 : vector<64x16xf32> to vector<64x16xbf16>
    %8 = vector.shape_cast %7 : vector<64x16xbf16> to vector<8x8x16xbf16>
    %9 = vector.extract_strided_slice %8 {offsets = [0, 0, 0], sizes = [8, 8, 8], strides = [1, 1, 1]} : vector<8x8x16xbf16> to vector<8x8x8xbf16>
    %10 = vector.extract_strided_slice %9 {offsets = [0, 0, 0], sizes = [8, 1, 8], strides = [1, 1, 1]} : vector<8x8x8xbf16> to vector<8x1x8xbf16>
    %11 = vector.shape_cast %10 : vector<8x1x8xbf16> to vector<8x8xbf16>
    %c0_5 = arith.constant 0 : index
    %c0_6 = arith.constant 0 : index
    %12 = vector.load %arg6[%c0_5, %c0_6] : memref<32x64xbf16, #tpu.memory_space<vmem>>, vector<8x8xbf16>
    tpu.vector_store %arg6[%c0_5, %c0_6], %11 {strides = array<i32>} : memref<32x64xbf16, #tpu.memory_space<vmem>>, vector<8x8xbf16>,
    %13 = vector.extract_strided_slice %9 {offsets = [0, 1, 0], sizes = [8, 1, 8], strides = [1, 1, 1]} : vector<8x8x8xbf16> to vector<8x1x8xbf16>
    %14 = vector.shape_cast %13 : vector<8x1x8xbf16> to vector<8x8xbf16>
    %c0_7 = arith.constant 0 : index
    %c8 = arith.constant 8 : index
    %15 = vector.load %arg6[%c0_7, %c8] : memref<32x64xbf16, #tpu.memory_space<vmem>>, vector<8x8xbf16>
    tpu.vector_store %arg6[%c0_7, %c8], %14 {strides = array<i32>} : memref<32x64xbf16, #tpu.memory_space<vmem>>, vector<8x8xbf16>,
    %16 = vector.extract_strided_slice %9 {offsets = [0, 2, 0], sizes = [8, 1, 8], strides = [1, 1, 1]} : vector<8x8x8xbf16> to vector<8x1x8xbf16>
    %17 = vector.shape_cast %16 : vector<8x1x8xbf16> to vector<8x8xbf16>
    %c0_8 = arith.constant 0 : index
    %c16 = arith.constant 16 : index
    %18 = vector.load %arg6[%c0_8, %c16] : memref<32x64xbf16, #tpu.memory_space<vmem>>, vector<8x8xbf16>
    tpu.vector_store %arg6[%c0_8, %c16], %17 {strides = array<i32>} : memref<32x64xbf16, #tpu.memory_space<vmem>>, vector<8x8xbf16>,
    %19 = vector.extract_strided_slice %9 {offsets = [0, 3, 0], sizes = [8, 1, 8], strides = [1, 1, 1]} : vector<8x8x8xbf16> to vector<8x1x8xbf16>
    %20 = vector.shape_cast %19 : vector<8x1x8xbf16> to vector<8x8xbf16>
    %c0_9 = arith.constant 0 : index
    %c24 = arith.constant 24 : index
    %21 = vector.load %arg6[%c0_9, %c24] : memref<32x64xbf16, #tpu.memory_space<vmem>>, vector<8x8xbf16>
    tpu.vector_store %arg6[%c0_9, %c24], %20 {strides = array<i32>} : memref<32x64xbf16, #tpu.memory_space<vmem>>, vector<8x8xbf16>,
    %22 = vector.extract_strided_slice %9 {offsets = [0, 4, 0], sizes = [8, 1, 8], strides = [1, 1, 1]} : vector<8x8x8xbf16> to vector<8x1x8xbf16>
    %23 = vector.shape_cast %22 : vector<8x1x8xbf16> to vector<8x8xbf16>
    %c0_10 = arith.constant 0 : index
    %c32 = arith.constant 32 : index
    %24 = vector.load %arg6[%c0_10, %c32] : memref<32x64xbf16, #tpu.memory_space<vmem>>, vector<8x8xbf16>
    tpu.vector_store %arg6[%c0_10, %c32], %23 {strides = array<i32>} : memref<32x64xbf16, #tpu.memory_space<vmem>>, vector<8x8xbf16>,
    %25 = vector.extract_strided_slice %9 {offsets = [0, 5, 0], sizes = [8, 1, 8], strides = [1, 1, 1]} : vector<8x8x8xbf16> to vector<8x1x8xbf16>
    %26 = vector.shape_cast %25 : vector<8x1x8xbf16> to vector<8x8xbf16>
    %c0_11 = arith.constant 0 : index
    %c40 = arith.constant 40 : index
    %27 = vector.load %arg6[%c0_11, %c40] : memref<32x64xbf16, #tpu.memory_space<vmem>>, vector<8x8xbf16>
    tpu.vector_store %arg6[%c0_11, %c40], %26 {strides = array<i32>} : memref<32x64xbf16, #tpu.memory_space<vmem>>, vector<8x8xbf16>,
    %28 = vector.extract_strided_slice %9 {offsets = [0, 6, 0], sizes = [8, 1, 8], strides = [1, 1, 1]} : vector<8x8x8xbf16> to vector<8x1x8xbf16>
    %29 = vector.shape_cast %28 : vector<8x1x8xbf16> to vector<8x8xbf16>
    %c0_12 = arith.constant 0 : index
    %c48 = arith.constant 48 : index
    %30 = vector.load %arg6[%c0_12, %c48] : memref<32x64xbf16, #tpu.memory_space<vmem>>, vector<8x8xbf16>
    tpu.vector_store %arg6[%c0_12, %c48], %29 {strides = array<i32>} : memref<32x64xbf16, #tpu.memory_space<vmem>>, vector<8x8xbf16>,
    %31 = vector.extract_strided_slice %9 {offsets = [0, 7, 0], sizes = [8, 1, 8], strides = [1, 1, 1]} : vector<8x8x8xbf16> to vector<8x1x8xbf16>
    %32 = vector.shape_cast %31 : vector<8x1x8xbf16> to vector<8x8xbf16>
    %c0_13 = arith.constant 0 : index
    %c56 = arith.constant 56 : index
    %33 = vector.load %arg6[%c0_13, %c56] : memref<32x64xbf16, #tpu.memory_space<vmem>>, vector<8x8xbf16>
    tpu.vector_store %arg6[%c0_13, %c56], %32 {strides = array<i32>} : memref<32x64xbf16, #tpu.memory_space<vmem>>, vector<8x8xbf16>,
    %34 = vector.extract_strided_slice %8 {offsets = [0, 0, 8], sizes = [8, 8, 8], strides = [1, 1, 1]} : vector<8x8x16xbf16> to vector<8x8x8xbf16>
    %35 = vector.extract_strided_slice %34 {offsets = [0, 0, 0], sizes = [8, 1, 8], strides = [1, 1, 1]} : vector<8x8x8xbf16> to vector<8x1x8xbf16>
    %36 = vector.shape_cast %35 : vector<8x1x8xbf16> to vector<8x8xbf16>
    %c8_14 = arith.constant 8 : index
    %c0_15 = arith.constant 0 : index
    %37 = vector.load %arg6[%c8_14, %c0_15] : memref<32x64xbf16, #tpu.memory_space<vmem>>, vector<8x8xbf16>
    tpu.vector_store %arg6[%c8_14, %c0_15], %36 {strides = array<i32>} : memref<32x64xbf16, #tpu.memory_space<vmem>>, vector<8x8xbf16>,
    %38 = vector.extract_strided_slice %34 {offsets = [0, 1, 0], sizes = [8, 1, 8], strides = [1, 1, 1]} : vector<8x8x8xbf16> to vector<8x1x8xbf16>
    %39 = vector.shape_cast %38 : vector<8x1x8xbf16> to vector<8x8xbf16>
    %c8_16 = arith.constant 8 : index
    %c8_17 = arith.constant 8 : index
    %40 = vector.load %arg6[%c8_16, %c8_17] : memref<32x64xbf16, #tpu.memory_space<vmem>>, vector<8x8xbf16>
    tpu.vector_store %arg6[%c8_16, %c8_17], %39 {strides = array<i32>} : memref<32x64xbf16, #tpu.memory_space<vmem>>, vector<8x8xbf16>,
    %41 = vector.extract_strided_slice %34 {offsets = [0, 2, 0], sizes = [8, 1, 8], strides = [1, 1, 1]} : vector<8x8x8xbf16> to vector<8x1x8xbf16>
    %42 = vector.shape_cast %41 : vector<8x1x8xbf16> to vector<8x8xbf16>
    %c8_18 = arith.constant 8 : index
    %c16_19 = arith.constant 16 : index
    %43 = vector.load %arg6[%c8_18, %c16_19] : memref<32x64xbf16, #tpu.memory_space<vmem>>, vector<8x8xbf16>
    tpu.vector_store %arg6[%c8_18, %c16_19], %42 {strides = array<i32>} : memref<32x64xbf16, #tpu.memory_space<vmem>>, vector<8x8xbf16>,
    %44 = vector.extract_strided_slice %34 {offsets = [0, 3, 0], sizes = [8, 1, 8], strides = [1, 1, 1]} : vector<8x8x8xbf16> to vector<8x1x8xbf16>
    %45 = vector.shape_cast %44 : vector<8x1x8xbf16> to vector<8x8xbf16>
    %c8_20 = arith.constant 8 : index
    %c24_21 = arith.constant 24 : index
    %46 = vector.load %arg6[%c8_20, %c24_21] : memref<32x64xbf16, #tpu.memory_space<vmem>>, vector<8x8xbf16>
    tpu.vector_store %arg6[%c8_20, %c24_21], %45 {strides = array<i32>} : memref<32x64xbf16, #tpu.memory_space<vmem>>, vector<8x8xbf16>,
    %47 = vector.extract_strided_slice %34 {offsets = [0, 4, 0], sizes = [8, 1, 8], strides = [1, 1, 1]} : vector<8x8x8xbf16> to vector<8x1x8xbf16>
    %48 = vector.shape_cast %47 : vector<8x1x8xbf16> to vector<8x8xbf16>
    %c8_22 = arith.constant 8 : index
    %c32_23 = arith.constant 32 : index
    %49 = vector.load %arg6[%c8_22, %c32_23] : memref<32x64xbf16, #tpu.memory_space<vmem>>, vector<8x8xbf16>
    tpu.vector_store %arg6[%c8_22, %c32_23], %48 {strides = array<i32>} : memref<32x64xbf16, #tpu.memory_space<vmem>>, vector<8x8xbf16>,
    %50 = vector.extract_strided_slice %34 {offsets = [0, 5, 0], sizes = [8, 1, 8], strides = [1, 1, 1]} : vector<8x8x8xbf16> to vector<8x1x8xbf16>
    %51 = vector.shape_cast %50 : vector<8x1x8xbf16> to vector<8x8xbf16>
    %c8_24 = arith.constant 8 : index
    %c40_25 = arith.constant 40 : index
    %52 = vector.load %arg6[%c8_24, %c40_25] : memref<32x64xbf16, #tpu.memory_space<vmem>>, vector<8x8xbf16>
    tpu.vector_store %arg6[%c8_24, %c40_25], %51 {strides = array<i32>} : memref<32x64xbf16, #tpu.memory_space<vmem>>, vector<8x8xbf16>,
    %53 = vector.extract_strided_slice %34 {offsets = [0, 6, 0], sizes = [8, 1, 8], strides = [1, 1, 1]} : vector<8x8x8xbf16> to vector<8x1x8xbf16>
    %54 = vector.shape_cast %53 : vector<8x1x8xbf16> to vector<8x8xbf16>
    %c8_26 = arith.constant 8 : index
    %c48_27 = arith.constant 48 : index
    %55 = vector.load %arg6[%c8_26, %c48_27] : memref<32x64xbf16, #tpu.memory_space<vmem>>, vector<8x8xbf16>
    tpu.vector_store %arg6[%c8_26, %c48_27], %54 {strides = array<i32>} : memref<32x64xbf16, #tpu.memory_space<vmem>>, vector<8x8xbf16>,
    %56 = vector.extract_strided_slice %34 {offsets = [0, 7, 0], sizes = [8, 1, 8], strides = [1, 1, 1]} : vector<8x8x8xbf16> to vector<8x1x8xbf16>
    %57 = vector.shape_cast %56 : vector<8x1x8xbf16> to vector<8x8xbf16>
    %c8_28 = arith.constant 8 : index
    %c56_29 = arith.constant 56 : index
    %58 = vector.load %arg6[%c8_28, %c56_29] : memref<32x64xbf16, #tpu.memory_space<vmem>>, vector<8x8xbf16>
    tpu.vector_store %arg6[%c8_28, %c56_29], %57 {strides = array<i32>} : memref<32x64xbf16, #tpu.memory_space<vmem>>, vector<8x8xbf16>,
    %59 = vector.extract_strided_slice %4 {offsets = [0, 16], sizes = [64, 16], strides = [1, 1]} : vector<64x32xbf16> to vector<64x16xbf16>
    %cst_30 = arith.constant dense<0.000000e+00> : vector<64x16xf32>
    %60 = tpu.matmul %59, %0, %cst_30 {dimension_numbers = #tpu.dot_dimension_numbers<[1], [0], [0], [1], [0, 0, 1, 1], [], []>} : vector<64x16xbf16>, vector<16x16xbf16>, vector<64x16xf32> -> vector<64x16xf32>
    %61 = arith.truncf %60 : vector<64x16xf32> to vector<64x16xbf16>
    %62 = vector.shape_cast %61 : vector<64x16xbf16> to vector<8x8x16xbf16>
    %63 = vector.extract_strided_slice %62 {offsets = [0, 0, 0], sizes = [8, 8, 8], strides = [1, 1, 1]} : vector<8x8x16xbf16> to vector<8x8x8xbf16>
    %64 = vector.extract_strided_slice %63 {offsets = [0, 0, 0], sizes = [8, 1, 8], strides = [1, 1, 1]} : vector<8x8x8xbf16> to vector<8x1x8xbf16>
    %65 = vector.shape_cast %64 : vector<8x1x8xbf16> to vector<8x8xbf16>
    %c16_31 = arith.constant 16 : index
    %c0_32 = arith.constant 0 : index
    %66 = vector.load %arg6[%c16_31, %c0_32] : memref<32x64xbf16, #tpu.memory_space<vmem>>, vector<8x8xbf16>
    tpu.vector_store %arg6[%c16_31, %c0_32], %65 {strides = array<i32>} : memref<32x64xbf16, #tpu.memory_space<vmem>>, vector<8x8xbf16>,
    %67 = vector.extract_strided_slice %63 {offsets = [0, 1, 0], sizes = [8, 1, 8], strides = [1, 1, 1]} : vector<8x8x8xbf16> to vector<8x1x8xbf16>
    %68 = vector.shape_cast %67 : vector<8x1x8xbf16> to vector<8x8xbf16>
    %c16_33 = arith.constant 16 : index
    %c8_34 = arith.constant 8 : index
    %69 = vector.load %arg6[%c16_33, %c8_34] : memref<32x64xbf16, #tpu.memory_space<vmem>>, vector<8x8xbf16>
    tpu.vector_store %arg6[%c16_33, %c8_34], %68 {strides = array<i32>} : memref<32x64xbf16, #tpu.memory_space<vmem>>, vector<8x8xbf16>,
    %70 = vector.extract_strided_slice %63 {offsets = [0, 2, 0], sizes = [8, 1, 8], strides = [1, 1, 1]} : vector<8x8x8xbf16> to vector<8x1x8xbf16>
    %71 = vector.shape_cast %70 : vector<8x1x8xbf16> to vector<8x8xbf16>
    %c16_35 = arith.constant 16 : index
    %c16_36 = arith.constant 16 : index
    %72 = vector.load %arg6[%c16_35, %c16_36] : memref<32x64xbf16, #tpu.memory_space<vmem>>, vector<8x8xbf16>
    tpu.vector_store %arg6[%c16_35, %c16_36], %71 {strides = array<i32>} : memref<32x64xbf16, #tpu.memory_space<vmem>>, vector<8x8xbf16>,
    %73 = vector.extract_strided_slice %63 {offsets = [0, 3, 0], sizes = [8, 1, 8], strides = [1, 1, 1]} : vector<8x8x8xbf16> to vector<8x1x8xbf16>
    %74 = vector.shape_cast %73 : vector<8x1x8xbf16> to vector<8x8xbf16>
    %c16_37 = arith.constant 16 : index
    %c24_38 = arith.constant 24 : index
    %75 = vector.load %arg6[%c16_37, %c24_38] : memref<32x64xbf16, #tpu.memory_space<vmem>>, vector<8x8xbf16>
    tpu.vector_store %arg6[%c16_37, %c24_38], %74 {strides = array<i32>} : memref<32x64xbf16, #tpu.memory_space<vmem>>, vector<8x8xbf16>,
    %76 = vector.extract_strided_slice %63 {offsets = [0, 4, 0], sizes = [8, 1, 8], strides = [1, 1, 1]} : vector<8x8x8xbf16> to vector<8x1x8xbf16>
    %77 = vector.shape_cast %76 : vector<8x1x8xbf16> to vector<8x8xbf16>
    %c16_39 = arith.constant 16 : index
    %c32_40 = arith.constant 32 : index
    %78 = vector.load %arg6[%c16_39, %c32_40] : memref<32x64xbf16, #tpu.memory_space<vmem>>, vector<8x8xbf16>
    tpu.vector_store %arg6[%c16_39, %c32_40], %77 {strides = array<i32>} : memref<32x64xbf16, #tpu.memory_space<vmem>>, vector<8x8xbf16>,
    %79 = vector.extract_strided_slice %63 {offsets = [0, 5, 0], sizes = [8, 1, 8], strides = [1, 1, 1]} : vector<8x8x8xbf16> to vector<8x1x8xbf16>
    %80 = vector.shape_cast %79 : vector<8x1x8xbf16> to vector<8x8xbf16>
    %c16_41 = arith.constant 16 : index
    %c40_42 = arith.constant 40 : index
    %81 = vector.load %arg6[%c16_41, %c40_42] : memref<32x64xbf16, #tpu.memory_space<vmem>>, vector<8x8xbf16>
    tpu.vector_store %arg6[%c16_41, %c40_42], %80 {strides = array<i32>} : memref<32x64xbf16, #tpu.memory_space<vmem>>, vector<8x8xbf16>,
    %82 = vector.extract_strided_slice %63 {offsets = [0, 6, 0], sizes = [8, 1, 8], strides = [1, 1, 1]} : vector<8x8x8xbf16> to vector<8x1x8xbf16>
    %83 = vector.shape_cast %82 : vector<8x1x8xbf16> to vector<8x8xbf16>
    %c16_43 = arith.constant 16 : index
    %c48_44 = arith.constant 48 : index
    %84 = vector.load %arg6[%c16_43, %c48_44] : memref<32x64xbf16, #tpu.memory_space<vmem>>, vector<8x8xbf16>
    tpu.vector_store %arg6[%c16_43, %c48_44], %83 {strides = array<i32>} : memref<32x64xbf16, #tpu.memory_space<vmem>>, vector<8x8xbf16>,
    %85 = vector.extract_strided_slice %63 {offsets = [0, 7, 0], sizes = [8, 1, 8], strides = [1, 1, 1]} : vector<8x8x8xbf16> to vector<8x1x8xbf16>
    %86 = vector.shape_cast %85 : vector<8x1x8xbf16> to vector<8x8xbf16>
    %c16_45 = arith.constant 16 : index
    %c56_46 = arith.constant 56 : index
    %87 = vector.load %arg6[%c16_45, %c56_46] : memref<32x64xbf16, #tpu.memory_space<vmem>>, vector<8x8xbf16>
    tpu.vector_store %arg6[%c16_45, %c56_46], %86 {strides = array<i32>} : memref<32x64xbf16, #tpu.memory_space<vmem>>, vector<8x8xbf16>,
    %88 = vector.extract_strided_slice %62 {offsets = [0, 0, 8], sizes = [8, 8, 8], strides = [1, 1, 1]} : vector<8x8x16xbf16> to vector<8x8x8xbf16>
    %89 = vector.extract_strided_slice %88 {offsets = [0, 0, 0], sizes = [8, 1, 8], strides = [1, 1, 1]} : vector<8x8x8xbf16> to vector<8x1x8xbf16>
    %90 = vector.shape_cast %89 : vector<8x1x8xbf16> to vector<8x8xbf16>
    %c24_47 = arith.constant 24 : index
    %c0_48 = arith.constant 0 : index
    %91 = vector.load %arg6[%c24_47, %c0_48] : memref<32x64xbf16, #tpu.memory_space<vmem>>, vector<8x8xbf16>
    tpu.vector_store %arg6[%c24_47, %c0_48], %90 {strides = array<i32>} : memref<32x64xbf16, #tpu.memory_space<vmem>>, vector<8x8xbf16>,
    %92 = vector.extract_strided_slice %88 {offsets = [0, 1, 0], sizes = [8, 1, 8], strides = [1, 1, 1]} : vector<8x8x8xbf16> to vector<8x1x8xbf16>
    %93 = vector.shape_cast %92 : vector<8x1x8xbf16> to vector<8x8xbf16>
    %c24_49 = arith.constant 24 : index
    %c8_50 = arith.constant 8 : index
    %94 = vector.load %arg6[%c24_49, %c8_50] : memref<32x64xbf16, #tpu.memory_space<vmem>>, vector<8x8xbf16>
    tpu.vector_store %arg6[%c24_49, %c8_50], %93 {strides = array<i32>} : memref<32x64xbf16, #tpu.memory_space<vmem>>, vector<8x8xbf16>,
    %95 = vector.extract_strided_slice %88 {offsets = [0, 2, 0], sizes = [8, 1, 8], strides = [1, 1, 1]} : vector<8x8x8xbf16> to vector<8x1x8xbf16>
    %96 = vector.shape_cast %95 : vector<8x1x8xbf16> to vector<8x8xbf16>
    %c24_51 = arith.constant 24 : index
    %c16_52 = arith.constant 16 : index
    %97 = vector.load %arg6[%c24_51, %c16_52] : memref<32x64xbf16, #tpu.memory_space<vmem>>, vector<8x8xbf16>
    tpu.vector_store %arg6[%c24_51, %c16_52], %96 {strides = array<i32>} : memref<32x64xbf16, #tpu.memory_space<vmem>>, vector<8x8xbf16>,
    %98 = vector.extract_strided_slice %88 {offsets = [0, 3, 0], sizes = [8, 1, 8], strides = [1, 1, 1]} : vector<8x8x8xbf16> to vector<8x1x8xbf16>
    %99 = vector.shape_cast %98 : vector<8x1x8xbf16> to vector<8x8xbf16>
    %c24_53 = arith.constant 24 : index
    %c24_54 = arith.constant 24 : index
    %100 = vector.load %arg6[%c24_53, %c24_54] : memref<32x64xbf16, #tpu.memory_space<vmem>>, vector<8x8xbf16>
    tpu.vector_store %arg6[%c24_53, %c24_54], %99 {strides = array<i32>} : memref<32x64xbf16, #tpu.memory_space<vmem>>, vector<8x8xbf16>,
    %101 = vector.extract_strided_slice %88 {offsets = [0, 4, 0], sizes = [8, 1, 8], strides = [1, 1, 1]} : vector<8x8x8xbf16> to vector<8x1x8xbf16>
    %102 = vector.shape_cast %101 : vector<8x1x8xbf16> to vector<8x8xbf16>
    %c24_55 = arith.constant 24 : index
    %c32_56 = arith.constant 32 : index
    %103 = vector.load %arg6[%c24_55, %c32_56] : memref<32x64xbf16, #tpu.memory_space<vmem>>, vector<8x8xbf16>
    tpu.vector_store %arg6[%c24_55, %c32_56], %102 {strides = array<i32>} : memref<32x64xbf16, #tpu.memory_space<vmem>>, vector<8x8xbf16>,
    %104 = vector.extract_strided_slice %88 {offsets = [0, 5, 0], sizes = [8, 1, 8], strides = [1, 1, 1]} : vector<8x8x8xbf16> to vector<8x1x8xbf16>
    %105 = vector.shape_cast %104 : vector<8x1x8xbf16> to vector<8x8xbf16>
    %c24_57 = arith.constant 24 : index
    %c40_58 = arith.constant 40 : index
    %106 = vector.load %arg6[%c24_57, %c40_58] : memref<32x64xbf16, #tpu.memory_space<vmem>>, vector<8x8xbf16>
    tpu.vector_store %arg6[%c24_57, %c40_58], %105 {strides = array<i32>} : memref<32x64xbf16, #tpu.memory_space<vmem>>, vector<8x8xbf16>,
    %107 = vector.extract_strided_slice %88 {offsets = [0, 6, 0], sizes = [8, 1, 8], strides = [1, 1, 1]} : vector<8x8x8xbf16> to vector<8x1x8xbf16>
    %108 = vector.shape_cast %107 : vector<8x1x8xbf16> to vector<8x8xbf16>
    %c24_59 = arith.constant 24 : index
    %c48_60 = arith.constant 48 : index
    %109 = vector.load %arg6[%c24_59, %c48_60] : memref<32x64xbf16, #tpu.memory_space<vmem>>, vector<8x8xbf16>
    tpu.vector_store %arg6[%c24_59, %c48_60], %108 {strides = array<i32>} : memref<32x64xbf16, #tpu.memory_space<vmem>>, vector<8x8xbf16>,
    %110 = vector.extract_strided_slice %88 {offsets = [0, 7, 0], sizes = [8, 1, 8], strides = [1, 1, 1]} : vector<8x8x8xbf16> to vector<8x1x8xbf16>
    %111 = vector.shape_cast %110 : vector<8x1x8xbf16> to vector<8x8xbf16>
    %c24_61 = arith.constant 24 : index
    %c56_62 = arith.constant 56 : index
    %112 = vector.load %arg6[%c24_61, %c56_62] : memref<32x64xbf16, #tpu.memory_space<vmem>>, vector<8x8xbf16>
    tpu.vector_store %arg6[%c24_61, %c56_62], %111 {strides = array<i32>} : memref<32x64xbf16, #tpu.memory_space<vmem>>, vector<8x8xbf16>,
    %c0_63 = arith.constant 0 : index
    %c0_64 = arith.constant 0 : index
    %113 = vector.load %arg3[%c0_63, %c0_64] : memref<16x32xbf16, #tpu.memory_space<vmem>>, vector<16x32xbf16>
    %c0_65 = arith.constant 0 : index
    %c0_66 = arith.constant 0 : index
    %114 = vector.load %arg6[%c0_65, %c0_66] : memref<32x64xbf16, #tpu.memory_space<vmem>>, vector<32x64xbf16>
    %cst_67 = arith.constant dense<0.000000e+00> : vector<16x64xf32>
    %115 = tpu.matmul %113, %114, %cst_67 {dimension_numbers = #tpu.dot_dimension_numbers<[1], [0], [0], [1], [0, 0, 1, 1], [], []>} : vector<16x32xbf16>, vector<32x64xbf16>, vector<16x64xf32> -> vector<16x64xf32>
    %c0_68 = arith.constant 0 : index
    %c0_69 = arith.constant 0 : index
    %c0_70 = arith.constant 0 : index
    %116 = vector.load %arg5[%c0_68, %c0_69, %c0_70] : memref<1x16x64xf32, #tpu.memory_space<vmem>>, vector<1x16x64xf32>
    %117 = vector.shape_cast %116 : vector<1x16x64xf32> to vector<16x64xf32>
    %118 = vector.shape_cast %115 : vector<16x64xf32> to vector<1x16x64xf32>
    tpu.vector_store %arg5[%c0_68, %c0_69, %c0_70], %118 {strides = array<i32>} : memref<1x16x64xf32, #tpu.memory_space<vmem>>, vector<1x16x64xf32>,
    return
  }
  func.func @transform_0(%arg0: i32, %arg1: i32) -> (i32, i32, i32, i32) {
    %c0_i32 = arith.constant 0 : i32
    %c0_i32_0 = arith.constant 0 : i32
    %c0_i32_1 = arith.constant 0 : i32
    return %arg0, %c0_i32, %arg1, %c0_i32_0 : i32, i32, i32, i32
  }
  func.func @transform_1(%arg0: i32, %arg1: i32) -> (i32, i32) {
    %c0_i32 = arith.constant 0 : i32
    %c0_i32_0 = arith.constant 0 : i32
    %c0_i32_1 = arith.constant 0 : i32
    return %c0_i32, %c0_i32_0 : i32, i32
  }
  func.func @transform_2(%arg0: i32, %arg1: i32) -> (i32, i32) {
    %c0_i32 = arith.constant 0 : i32
    %c0_i32_0 = arith.constant 0 : i32
    %c0_i32_1 = arith.constant 0 : i32
    return %c0_i32, %c0_i32_0 : i32, i32
  }
  func.func @transform_3(%arg0: i32, %arg1: i32) -> (i32, i32, i32) {
    %c0_i32 = arith.constant 0 : i32
    %c0_i32_0 = arith.constant 0 : i32
    return %arg0, %c0_i32, %arg1 : i32, i32, i32
  }
}

</mosaic_0001>

<bundles_post_ra>
// kernel: patch_merging_forward.1
= control target key start
LH: loop header
LB: loop body
LE: loop exit
PB: predicated region body
PF: predicated region fallthrough
CT: control target
= control target key end

     0   :  { %s1204_s12 = smov 0   ;;  %s1206_s13 = smov 0   ;;  %s1629_s0 = inlined_call_operand.vmem [shape: f32[2,8,8,32], index: 0, kind: input, shape index: {}]   ;;  %s1630_s1 = inlined_call_operand.vmem [shape: bf16[16,32], index: 1, kind: input, shape index: {}]   ;;  %s1631_s2 = inlined_call_operand.vmem [shape: bf16[16,16], index: 2, kind: input, shape index: {}]   ;;  %s1632_s3 = inlined_call_operand.vmem [shape: f32[2,16,64], index: 3, kind: output, shape index: {}]  }
   0x1   :  { %s1208_s14 = smov 0  }
   0x2 LB: > { %s25_s15 = sadd.s32 1, %s1167_s13  ;;  %p1007_p0 = scmp.ge.s32.totalorder %s1171_s14, 1  ;;  %s1171_s14 = sphi %s1208_s14, %s13_s14   ;;  %s1167_s13 = sphi %s1206_s13, %s1634_s13   ;;  %s1163_s12 = sphi %s1204_s12, %s1633_s12  }
   0x3   : > { %p27_p1 = scmp.ge.s32.totalorder %s25_s15, 2  ;;  %p156_p2 = scmp.lt.s32.totalorder %s1171_s14, 3 }
   0x5   : > { %s1636_s15 = smov (%p27_p1, %s25_s15), 0  ;;  %p157_p3 = pnand %p1007_p0, %p156_p2 }
   0x6   : > { %p186_p4 = scmp.lt.s32.totalorder (!%p157_p3), %s1163_s12, 1  ;;  %s1173_s22 = smov (!%p157_p3), 112  }
   0x7   : > { %160 = sbr.rel (%p157_p3) target bundleno = 706 (0x2c2), region = 32  ;;  %s1174_s23 = smov (!%p157_p3), 40  }
   0x8   : > { %s1175_s24 = smov (!%p157_p3), 32   ;;  %s1176_s25 = smov (!%p157_p3), 120  }
   0x9   : > { %s1177_s26 = smov (!%p157_p3), 8   ;;  %s1178_s27 = smov (!%p157_p3), 16  }
   0xa   : > { %s1179_s28 = smov (!%p157_p3), 24   ;;  %s1180_s29 = smov (!%p157_p3), 48  }
   0xb   : > { %s1182_s30 = smov (!%p157_p3), 56  }
   0xc   : > { %v1145_v0 = vld [vmem:[%s1631_s2] sm:$0xff]   ;;  %s1638_s12 = smov (!%p186_p4, %s1163_s12), 1  ;;  %vm247_vm0 = vcmask 130048   ;;  %vm358_vm1 = vcmask 1041409   ;;  %vm361_vm2 = vcmask 1042434   ;;  %vm364_vm3 = vcmask 1043459  }
   0xd   : > { %1082 = vmatprep.subr.bf16.mxu0 %v1145_v0  ;;  %1092 = vmatprep.subr.bf16.mxu1 %v1145_v0  ;;  %s1047_s18 = sshll.u32 %s1638_s12, 6  ;;  %vm367_vm4 = vcmask 1044484   ;;  %vm370_vm5 = vcmask 1045509   ;;  %vm373_vm6 = vcmask 1046534   ;;  %vm376_vm7 = vcmask 1047559   ;;  %s1048_s6 = sshll.u32 %s1638_s12, 4 }
   0xe   : > { %1083 = vmatpush3.bf16.msra.mxu0 %v1145_v0  ;;  %1093 = vmatpush3.bf16.msra.mxu1 %v1145_v0  ;;  %s193_s21 = scalar_lea.vmem %s1629_s0, %s1047_s18  ;;  %vm380_vm8 = vcmask 60416   ;;  %vm400_vm9 = vcmask 126016   ;;  %vm420_vm10 = vcmask 191616   ;;  %vm440_vm11 = vcmask 257216   ;;  %s201_s9 = scalar_lea.vmem %s1632_s3, %s1048_s6 }
   0xf   : > { %v205_v1 = vld [vmem:[%s193_s21] sm:$0xff]  ;;  %v206_v2 = vld [vmem:[%s193_s21 + $0x8] sm:$0xff]  ;;  %v207_v3 = vld [vmem:[%s193_s21 + $0x10] sm:$0xff]  ;;  %vm460_vm12 = vcmask 322816   ;;  %vm480_vm13 = vcmask 388416   ;;  %vm500_vm14 = vcmask 454016  }
  0x10   : > { %v1049_v4 = vpack.c.bf16 %v206_v2, %v205_v1  ;;  %v208_v5 = vld [vmem:[%s193_s21 + $0x18] sm:$0xff]  ;;  %v209_v6 = vld [vmem:[%s193_s21 + $0x20] sm:$0xff]  ;;  %v210_v7 = vld [vmem:[%s193_s21 + $0x28] sm:$0xff]  ;;  %vm1183_vm15 = vmmov 0  }
  0x11   : > { %v1050_v8 = vpack.c.bf16 %v208_v5, %v207_v3  ;;  %v1051_v9 = vpack.c.bf16 %v210_v7, %v209_v6  ;;  %v211_v10 = vld [vmem:[%s193_s21 + $0x30] sm:$0xff]  ;;  %v212_v11 = vld [vmem:[%s193_s21 + $0x38] sm:$0xff] }
  0x12   : > { %552 = vrot.lane.b32.xlu0 %v1049_v4, %s1173_s22  ;;  %1084 = vmatprep.mubr.msk.bf16.mxu0 %vm247_vm0, %v1049_v4  ;;  %v1052_v12 = vpack.c.bf16 %v212_v11, %v211_v10 }
  0x13   : > { %1085 = vmatmul.mubr.msk.bf16.vlgmr.msra.gmra.mxu0 %vm247_vm0, %v1050_v8  ;;  %556 = vrot.lane.b32.xlu1 %v1051_v9, %s1173_s22 }
  0x14   : > { %1088 = vmatprep.mubr.msk.bf16.mxu0 %vm247_vm0, %v1051_v9 }
  0x16   : > { %554 = vrot.lane.b32.xlu0 %v1050_v8, %s1173_s22 }
  0x17   : > { %558 = vrot.lane.b32.xlu1 %v1052_v12, %s1173_s22 }
  0x1b   : > { %1089 = vmatmul.mubr.msk.bf16.gmra.mxu0 %vm247_vm0, %v1052_v12 }
  0x84   : > { %v553_v13 = vpop.permute.xlu0 %552 }
  0x85   : > { %1094 = vmatprep.mubr.msk.bf16.mxu1 %vm247_vm0, %v553_v13  ;;  %v557_v14 = vpop.permute.xlu1 %556 }
  0x88   : > { %v555_v15 = vpop.permute.xlu0 %554 }
  0x89   : > { %1095 = vmatmul.mubr.msk.bf16.vlgmr.msra.gmra.mxu1 %vm247_vm0, %v555_v15  ;;  %v559_v16 = vpop.permute.xlu1 %558 }
  0x8a   : > { %1098 = vmatprep.mubr.msk.bf16.mxu1 %vm247_vm0, %v557_v14 }
  0x91   : > { %1099 = vmatmul.mubr.msk.bf16.gmra.mxu1 %vm247_vm0, %v559_v16  ;;  %vm520_vm0 = vcmask 519616  }
  0xd3   : > { %v1086_v17 = vpop.f32.mrf.mxu0 }
  0xd4   : > { %v1055_v18 = vpack.c.bf16 %v1086_v17, %v1086_v17 }
  0xd5   : > { %v294_v19 = vpop.f32.mrf.mxu0 }
  0xd6   : > { %v1239_v20 = vunpack.c.l.b16 %v1055_v18  ;;  %v1053_v21 = vpack.c.bf16 %v294_v19, %v294_v19 }
  0xd7   : > { %v1087_v22 = vpop.f32.mrf.mxu0 }
  0xd8   : > { %v1241_v23 = vunpack.c.l.b16 %v1053_v21  ;;  %v1056_v24 = vpack.c.bf16 %v1087_v22, %v1087_v22  ;;  %v465_v25 = vrot.slane %v1239_v20, 3  ;;  %v360_v27 = vrot.slane %v1239_v20, 6 }
  0xd9   : > { %v297_v26 = vpop.f32.mrf.mxu0  ;;  %v384_v28 = vrot.slane %v1239_v20, 7  ;;  %v425_v29 = vrot.slane %v1239_v20, 1  ;;  %v445_v30 = vrot.slane %v1239_v20, 2  ;;  %v485_v34 = vrot.slane %v1239_v20, 4 }
  0xda   : > { %v1248_v31 = vunpack.c.l.b16 %v1056_v24  ;;  %v1054_v32 = vpack.c.bf16 %v297_v26, %v297_v26  ;;  %v462_v33 = vrot.slane %v1241_v23, 5  ;;  %v382_v36 = vrot.slane %v1241_v23, 1 }
  0xdb   : > { %v1090_v35 = vpop.f32.mrf.mxu0  ;;  %v402_v37 = vrot.slane %v1241_v23, 2  ;;  %v422_v38 = vrot.slane %v1241_v23, 3  ;;  %v442_v39 = vrot.slane %v1241_v23, 4  ;;  %v482_v43 = vrot.slane %v1241_v23, 6 }
  0xdc   : > { %v1256_v40 = vunpack.c.l.b16 %v1054_v32  ;;  %v1059_v41 = vpack.c.bf16 %v1090_v35, %v1090_v35  ;;  %v467_v42 = vrot.slane %v1248_v31, 2  ;;  %v363_v45 = vrot.slane %v1248_v31, 5 }
  0xdd   : > { %v310_v44 = vpop.f32.mrf.mxu0  ;;  %v386_v46 = vrot.slane %v1248_v31, 6  ;;  %v406_v47 = vrot.slane %v1248_v31, 7  ;;  %v447_v48 = vrot.slane %v1248_v31, 1 }
  0xde   : > { %v1264_v49 = vunpack.c.l.b16 %v1059_v41  ;;  %v1057_v50 = vpack.c.bf16 %v310_v44, %v310_v44  ;;  %v463_v51 = vrot.slane %v1256_v40, 4  ;;  %v357_v52 = vrot.slane %v1256_v40, 7 }
  0xdf   : > { %v1091_v53 = vpop.f32.mrf.mxu0  ;;  %v383_v54 = vsel %vm358_vm1, %v1256_v40, %v382_v36  ;;  %v403_v55 = vrot.slane %v1256_v40, 1  ;;  %v423_v56 = vrot.slane %v1256_v40, 2  ;;  %v443_v57 = vrot.slane %v1256_v40, 3 }
  0xe0   : > { %v1273_v58 = vunpack.c.l.b16 %v1057_v50  ;;  %v1060_v59 = vpack.c.bf16 %v1091_v53, %v1091_v53  ;;  %v464_v60 = vsel %vm358_vm1, %v463_v51, %v462_v33  ;;  %v472_v61 = vrot.slane %v1264_v49, 7 }
  0xe1   : > { %v313_v62 = vpop.f32.mrf.mxu0  ;;  %v466_v63 = vsel %vm361_vm2, %v465_v25, %v464_v60  ;;  %v359_v0 = vsel %vm358_vm1, %v357_v52, %v1241_v23  ;;  %v372_v1 = vrot.slane %v1264_v49, 2  ;;  %v385_v2 = vsel %vm361_vm2, %v384_v28, %v383_v54 }
  0xe2   : > { %v1282_v3 = vunpack.c.l.b16 %v1060_v59  ;;  %v1058_v4 = vpack.c.bf16 %v313_v62, %v313_v62  ;;  %v468_v5 = vsel %vm364_vm3, %v467_v42, %v466_v63  ;;  %v469_v6 = vrot.slane %v1273_v58, 1 }
  0xe3   : > { %v362_v7 = vsel %vm361_vm2, %v360_v27, %v359_v0  ;;  %v366_v8 = vrot.slane %v1273_v58, 4  ;;  %v387_v9 = vsel %vm364_vm3, %v386_v46, %v385_v2  ;;  %v388_v10 = vrot.slane %v1273_v58, 5 }
  0xe4   : > { %v1290_v11 = vunpack.c.l.b16 %v1058_v4  ;;  %v470_v12 = vsel %vm367_vm4, %v469_v6, %v468_v5  ;;  %v474_v13 = vrot.slane %v1282_v3, 6  ;;  %v365_v14 = vsel %vm364_vm3, %v363_v45, %v362_v7 }
  0xe5   : > { %v368_v15 = vsel %vm367_vm4, %v366_v8, %v365_v14  ;;  %v375_v16 = vrot.slane %v1282_v3, 1  ;;  %v389_v17 = vsel %vm367_vm4, %v388_v10, %v387_v9  ;;  %v392_v18 = vrot.slane %v1264_v49, 3 }
  0xe6   : > { %v471_v19 = vsel %vm370_vm5, %v1290_v11, %v470_v12  ;;  %v369_v21 = vrot.slane %v1290_v11, 3  ;;  %v390_v22 = vrot.slane %v1290_v11, 4  ;;  %v394_v24 = vrot.slane %v1282_v3, 2 }
  0xe7   : > { %v473_v25 = vsel %vm373_vm6, %v472_v61, %v471_v19  ;;  %v404_v26 = vsel %vm358_vm1, %v403_v55, %v402_v37  ;;  %v408_v27 = vrot.slane %v1273_v58, 6  ;;  %v410_v28 = vrot.slane %v1290_v11, 5 }
  0xe8   : > { %v475_v32 = vsel %vm376_vm7, %v474_v13, %v473_v25  ;;  %v371_v33 = vsel %vm370_vm5, %v369_v21, %v368_v15  ;;  %v391_v35 = vsel %vm370_vm5, %v390_v22, %v389_v17  ;;  %v405_v36 = vsel %vm361_vm2, %v1239_v20, %v404_v26 }
  0xe9   : > { %v476_v41 = vpack.c.b16 %v475_v32, %v475_v32  ;;  %v374_v42 = vsel %vm373_vm6, %v372_v1, %v371_v33  ;;  %v393_v44 = vsel %vm373_vm6, %v392_v18, %v391_v35  ;;  %v407_v37 = vsel %vm364_vm3, %v406_v47, %v405_v36 }
  0xea   : > { %v377_v45 = vsel %vm376_vm7, %v375_v16, %v374_v42  ;;  %v395_v46 = vsel %vm376_vm7, %v394_v24, %v393_v44  ;;  %v409_v50 = vsel %vm367_vm4, %v408_v27, %v407_v37  ;;  %v412_v51 = vrot.slane %v1264_v49, 4 }
  0xeb   : > { %477 = vrot.lane.b32.xlu0 %v476_v41, %s1174_s23  ;;  %v378_v52 = vpack.c.b16 %v377_v45, %v377_v45  ;;  %540 = vrot.lane.b32.xlu1 %v476_v41, %s1175_s24  ;;  %v1322_v53 = vpack.c.b16 %v395_v46, %v395_v46  ;;  %v411_v54 = vsel %vm370_vm5, %v410_v28, %v409_v50  ;;  %v414_v47 = vrot.slane %v1282_v3, 3 }
  0xec   : > { %v413_v55 = vsel %vm373_vm6, %v412_v51, %v411_v54  ;;  %v424_v59 = vsel %vm358_vm1, %v423_v56, %v422_v38  ;;  %v428_v60 = vrot.slane %v1273_v58, 7  ;;  %v430_v61 = vrot.slane %v1290_v11, 6 }
  0xed   : > { %v415_v62 = vsel %vm376_vm7, %v414_v47, %v413_v55  ;;  %v426_v63 = vsel %vm361_vm2, %v425_v29, %v424_v59  ;;  %v432_v0 = vrot.slane %v1264_v49, 5  ;;  %v487_v1 = vrot.slane %v1248_v31, 3  ;;  %381 = vst.msk [vmem:[#allocation2] sm:$0xf] %vm380_vm8, %v378_v52 }
  0xee   : > { %v427_v2 = vsel %vm364_vm3, %v1248_v31, %v426_v63  ;;  %v434_v38 = vrot.slane %v1282_v3, 4  ;;  %v444_v56 = vsel %vm358_vm1, %v443_v57, %v442_v39  ;;  %v450_v4 = vrot.slane %v1290_v11, 7 }
  0xef   : > { %522 = vrot.lane.b32.xlu0 %v378_v52, %s1176_s25  ;;  %397 = vrot.lane.b32.xlu1 %v1322_v53, %s1177_s26  ;;  %v416_v29 = vpack.c.b16 %v415_v62, %v415_v62  ;;  %v429_v5 = vsel %vm367_vm4, %v428_v60, %v427_v2  ;;  %v446_v6 = vsel %vm361_vm2, %v445_v30, %v444_v56  ;;  %v452_v7 = vrot.slane %v1264_v49, 6 }
  0xf0   : > { %v431_v39 = vsel %vm370_vm5, %v430_v61, %v429_v5  ;;  %v448_v57 = vsel %vm364_vm3, %v447_v48, %v446_v6  ;;  %v454_v8 = vrot.slane %v1282_v3, 5  ;;  %v483_v9 = vrot.slane %v1256_v40, 5 }
  0xf1   : > { %v433_v10 = vsel %vm373_vm6, %v432_v0, %v431_v39  ;;  %v449_v12 = vsel %vm367_vm4, %v1273_v58, %v448_v57  ;;  %v489_v13 = vrot.slane %v1273_v58, 2  ;;  %v491_v30 = vrot.slane %v1290_v11, 1 }
  0xf2   : > { %v435_v14 = vsel %vm376_vm7, %v434_v38, %v433_v10  ;;  %v451_v15 = vsel %vm370_vm5, %v450_v4, %v449_v12  ;;  %v484_v48 = vsel %vm358_vm1, %v483_v9, %v482_v43  ;;  %v494_v16 = vrot.slane %v1282_v3, 7 }
  0xf3   : > { %528 = vrot.lane.b32.xlu1 %v416_v29, %s1177_s26  ;;  %417 = vrot.lane.b32.xlu0 %v416_v29, %s1178_s27  ;;  %v436_v17 = vpack.c.b16 %v435_v14, %v435_v14  ;;  %v453_v18 = vsel %vm373_vm6, %v452_v7, %v451_v15  ;;  %v486_v19 = vsel %vm361_vm2, %v485_v34, %v484_v48  ;;  %v502_v21 = vrot.slane %v1241_v23, 7 }
  0xf4   : > { %v455_v22 = vsel %vm376_vm7, %v454_v8, %v453_v18  ;;  %v488_v43 = vsel %vm364_vm3, %v487_v1, %v486_v19  ;;  %v503_v24 = vrot.slane %v1256_v40, 6  ;;  %v505_v25 = vrot.slane %v1239_v20, 5 }
  0xf5   : > { %v490_v26 = vsel %vm367_vm4, %v489_v13, %v488_v43  ;;  %v507_v27 = vrot.slane %v1248_v31, 4  ;;  %v509_v28 = vrot.slane %v1273_v58, 3  ;;  %v511_v23 = vrot.slane %v1290_v11, 2 }
  0xf6   : > { %v492_v32 = vsel %vm370_vm5, %v491_v30, %v490_v26  ;;  %v504_v34 = vsel %vm358_vm1, %v503_v24, %v502_v21  ;;  %v456_v40 = vpack.c.b16 %v455_v22, %v455_v22  ;;  %v513_v31 = vrot.slane %v1264_v49, 1 }
  0xf7   : > { %532 = vrot.lane.b32.xlu1 %v436_v17, %s1178_s27  ;;  %437 = vrot.lane.b32.xlu0 %v436_v17, %s1179_s28  ;;  %v493_v20 = vsel %vm373_vm6, %v1264_v49, %v492_v32  ;;  %v506_v33 = vsel %vm361_vm2, %v505_v25, %v504_v34 }
  0xf8   : > { %v495_v58 = vsel %vm376_vm7, %v494_v16, %v493_v20  ;;  %v508_v35 = vsel %vm364_vm3, %v507_v27, %v506_v33 }
  0xf9   : > { %v510_v36 = vsel %vm367_vm4, %v509_v28, %v508_v35  ;;  %v496_v41 = vpack.c.b16 %v495_v58, %v495_v58 }
  0xfa   : > { %v512_v11 = vsel %vm370_vm5, %v511_v23, %v510_v36 }
  0xfb   : > { %536 = vrot.lane.b32.xlu1 %v456_v40, %s1179_s28  ;;  %457 = vrot.lane.b32.xlu0 %v456_v40, %s1175_s24  ;;  %v514_v42 = vsel %vm373_vm6, %v513_v31, %v512_v11 }
  0xfc   : > { %v1405_v44 = vsel %vm376_vm7, %v1282_v3, %v514_v42 }
  0xff   : > { %544 = vrot.lane.b32.xlu1 %v496_v41, %s1174_s23  ;;  %497 = vrot.lane.b32.xlu0 %v496_v41, %s1180_s29 }
 0x149   : > { %v1096_v49 = vpop.f32.mrf.mxu1 }
 0x14a   : > { %v1063_v37 = vpack.c.bf16 %v1096_v49, %v1096_v49 }
 0x14b   : > { %v606_v45 = vpop.f32.mrf.mxu1 }
 0x14c   : > { %v1409_v46 = vunpack.c.l.b16 %v1063_v37  ;;  %v1061_v50 = vpack.c.bf16 %v606_v45, %v606_v45 }
 0x14d   : > { %v1097_v51 = vpop.f32.mrf.mxu1 }
 0x14e   : > { %v1411_v52 = vunpack.c.l.b16 %v1061_v50  ;;  %v1064_v54 = vpack.c.bf16 %v1097_v51, %v1097_v51  ;;  %v765_v47 = vrot.slane %v1409_v46, 3  ;;  %v688_v3 = vrot.slane %v1409_v46, 7 }
 0x14f   : > { %v609_v55 = vpop.f32.mrf.mxu1  ;;  %v671_v59 = vrot.slane %v1409_v46, 6  ;;  %v727_v60 = vrot.slane %v1409_v46, 1  ;;  %v746_v61 = vrot.slane %v1409_v46, 2  ;;  %v784_v1 = vrot.slane %v1409_v46, 4 }
 0x150   : > { %v1418_v62 = vunpack.c.l.b16 %v1064_v54  ;;  %v1062_v63 = vpack.c.bf16 %v609_v55, %v609_v55  ;;  %v762_v0 = vrot.slane %v1411_v52, 5  ;;  %v686_v38 = vrot.slane %v1411_v52, 1 }
 0x151   : > { %v1100_v2 = vpop.f32.mrf.mxu1  ;;  %v705_v56 = vrot.slane %v1411_v52, 2  ;;  %v724_v4 = vrot.slane %v1411_v52, 3  ;;  %v743_v29 = vrot.slane %v1411_v52, 4  ;;  %v781_v39 = vrot.slane %v1411_v52, 6 }
 0x152   : > { %v1426_v5 = vunpack.c.l.b16 %v1062_v63  ;;  %v1067_v6 = vpack.c.bf16 %v1100_v2, %v1100_v2  ;;  %v767_v7 = vrot.slane %v1418_v62, 2  ;;  %v690_v8 = vrot.slane %v1418_v62, 6 }
 0x153   : > { %v622_v57 = vpop.f32.mrf.mxu1  ;;  %v673_v9 = vrot.slane %v1418_v62, 5  ;;  %v709_v10 = vrot.slane %v1418_v62, 7  ;;  %v748_v12 = vrot.slane %v1418_v62, 1 }
 0x154   : > { %v1434_v13 = vunpack.c.l.b16 %v1067_v6  ;;  %v1065_v30 = vpack.c.bf16 %v622_v57, %v622_v57  ;;  %v763_v14 = vrot.slane %v1426_v5, 4  ;;  %v687_v15 = vsel %vm358_vm1, %v1426_v5, %v686_v38 }
 0x155   : > { %v1101_v48 = vpop.f32.mrf.mxu1  ;;  %v689_v16 = vsel %vm361_vm2, %v688_v3, %v687_v15  ;;  %v669_v17 = vrot.slane %v1426_v5, 7  ;;  %v706_v18 = vrot.slane %v1426_v5, 1  ;;  %v725_v19 = vrot.slane %v1426_v5, 2 }
 0x156   : > { %v1443_v21 = vunpack.c.l.b16 %v1065_v30  ;;  %v1068_v22 = vpack.c.bf16 %v1101_v48, %v1101_v48  ;;  %v764_v43 = vsel %vm358_vm1, %v763_v14, %v762_v0  ;;  %v772_v24 = vrot.slane %v1434_v13, 7 }
 0x157   : > { %v625_v25 = vpop.f32.mrf.mxu1  ;;  %v766_v26 = vsel %vm361_vm2, %v765_v47, %v764_v43  ;;  %v691_v27 = vsel %vm364_vm3, %v690_v8, %v689_v16  ;;  %v696_v28 = vrot.slane %v1434_v13, 3  ;;  %v670_v32 = vsel %vm358_vm1, %v669_v17, %v1411_v52 }
 0x158   : > { %v1452_v34 = vunpack.c.l.b16 %v1068_v22  ;;  %v1066_v23 = vpack.c.bf16 %v625_v25, %v625_v25  ;;  %v768_v40 = vsel %vm364_vm3, %v767_v7, %v766_v26  ;;  %v769_v20 = vrot.slane %v1443_v21, 1 }
 0x159   : > { %v692_v33 = vrot.slane %v1443_v21, 5  ;;  %v672_v31 = vsel %vm361_vm2, %v671_v59, %v670_v32  ;;  %v675_v58 = vrot.slane %v1443_v21, 4  ;;  %v679_v35 = vrot.slane %v1434_v13, 2 }
 0x15a   : > { %v1460_v36 = vunpack.c.l.b16 %v1066_v23  ;;  %v770_v11 = vsel %vm367_vm4, %v769_v20, %v768_v40  ;;  %v774_v41 = vrot.slane %v1452_v34, 6  ;;  %v698_v42 = vrot.slane %v1452_v34, 2 }
 0x15b   : > { %v693_v49 = vsel %vm367_vm4, %v692_v33, %v691_v27  ;;  %v674_v37 = vsel %vm364_vm3, %v673_v9, %v672_v31  ;;  %v681_v45 = vrot.slane %v1452_v34, 1  ;;  %v707_v50 = vsel %vm358_vm1, %v706_v18, %v705_v56 }
 0x15c   : > { %v771_v51 = vsel %vm370_vm5, %v1460_v36, %v770_v11  ;;  %v694_v54 = vrot.slane %v1460_v36, 4  ;;  %v676_v47 = vsel %vm367_vm4, %v675_v58, %v674_v37  ;;  %v677_v55 = vrot.slane %v1460_v36, 3 }
 0x15d   : > { %v1474_v3 = vpop.permute.xlu0 %477  ;;  %v773_v59 = vsel %vm373_vm6, %v772_v24, %v771_v51  ;;  %v708_v63 = vsel %vm361_vm2, %v1409_v46, %v707_v50  ;;  %v711_v0 = vrot.slane %v1443_v21, 6  ;;  %v713_v2 = vrot.slane %v1460_v36, 5  ;;  %v1481_v38 = vpop.permute.xlu1 %540 }
 0x15e   : > { %v775_v56 = vsel %vm376_vm7, %v774_v41, %v773_v59  ;;  %v695_v6 = vsel %vm370_vm5, %v694_v54, %v693_v49  ;;  %v678_v7 = vsel %vm370_vm5, %v677_v55, %v676_v47  ;;  %v710_v57 = vsel %vm364_vm3, %v709_v10, %v708_v63 }
 0x15f   : > { %v776_v8 = vpack.c.b16 %v775_v56, %v775_v56  ;;  %v697_v9 = vsel %vm373_vm6, %v696_v28, %v695_v6  ;;  %v680_v30 = vsel %vm373_vm6, %v679_v35, %v678_v7  ;;  %v712_v14 = vsel %vm367_vm4, %v711_v0, %v710_v57 }
 0x160   : > { %v699_v15 = vsel %vm376_vm7, %v698_v42, %v697_v9  ;;  %v682_v48 = vsel %vm376_vm7, %v681_v45, %v680_v30  ;;  %v714_v16 = vsel %vm370_vm5, %v713_v2, %v712_v14  ;;  %v715_v17 = vrot.slane %v1434_v13, 4 }
 0x161   : > { %837 = vrot.lane.b32.xlu1 %v776_v8, %s1175_s24  ;;  %777 = vrot.lane.b32.xlu0 %v776_v8, %s1174_s23  ;;  %v523_v10 = vpop.permute.xlu0 %522  ;;  %v683_v18 = vpack.c.b16 %v682_v48, %v682_v48  ;;  %v717_v22 = vrot.slane %v1452_v34, 3  ;;  %v726_v43 = vsel %vm358_vm1, %v725_v19, %v724_v4  ;;  %v786_v24 = vrot.slane %v1418_v62, 3  ;;  %v398_v25 = vpop.permute.xlu1 %397 }
 0x162   : > { %525 = vst.msk [vmem:[#allocation2 + $0x4] sm:$0xf] %vm380_vm8, %v523_v10  ;;  %v716_v26 = vsel %vm373_vm6, %v715_v17, %v714_v16  ;;  %v728_v27 = vsel %vm361_vm2, %v727_v60, %v726_v43  ;;  %v730_v28 = vrot.slane %v1443_v21, 7  ;;  %v732_v32 = vrot.slane %v1460_v36, 6 }
 0x163   : > { %401 = vst.msk [vmem:[#allocation2] sm:$0xf] %vm400_vm9, %v398_v25  ;;  %527 = vst.msk [vmem:[#allocation2 + $0x4] sm:$0xf] %vm400_vm9, %v1322_v53  ;;  %v1511_v4 = vpack.c.b16 %v699_v15, %v699_v15  ;;  %v718_v19 = vsel %vm376_vm7, %v717_v22, %v716_v26  ;;  %v729_v23 = vsel %vm364_vm3, %v1418_v62, %v728_v27  ;;  %v734_v60 = vrot.slane %v1434_v13, 5 }
 0x164   : > { %685 = vst.msk [vmem:[#allocation2 + $0x8] sm:$0xf] %vm380_vm8, %v683_v18  ;;  %v719_v40 = vpack.c.b16 %v718_v19, %v718_v19  ;;  %v731_v20 = vsel %vm367_vm4, %v730_v28, %v729_v23  ;;  %v736_v33 = vrot.slane %v1452_v34, 4  ;;  %v744_v31 = vrot.slane %v1426_v5, 3 }
 0x165   : > { %701 = vrot.lane.b32.xlu1 %v1511_v4, %s1177_s26  ;;  %819 = vrot.lane.b32.xlu0 %v683_v18, %s1176_s25  ;;  %v733_v53 = vsel %vm370_vm5, %v732_v32, %v731_v20  ;;  %v751_v58 = vrot.slane %v1460_v36, 7  ;;  %v753_v35 = vrot.slane %v1434_v13, 6  ;;  %v782_v11 = vrot.slane %v1426_v5, 5  ;;  %v529_v41 = vpop.permute.xlu1 %528  ;;  %v418_v42 = vpop.permute.xlu0 %417 }
 0x166   : > { %v735_v49 = vsel %vm373_vm6, %v734_v60, %v733_v53  ;;  %v745_v37 = vsel %vm358_vm1, %v744_v31, %v743_v29  ;;  %v755_v45 = vrot.slane %v1452_v34, 5  ;;  %v788_v50 = vrot.slane %v1443_v21, 2  ;;  %531 = vst.msk [vmem:[#allocation2 + $0x4] sm:$0xf] %vm420_vm10, %v529_v41  ;;  %421 = vst.msk [vmem:[#allocation2] sm:$0xf] %vm420_vm10, %v418_v42 }
 0x167   : > { %v737_v51 = vsel %vm376_vm7, %v736_v33, %v735_v49  ;;  %v747_v54 = vsel %vm361_vm2, %v746_v61, %v745_v37  ;;  %v783_v47 = vsel %vm358_vm1, %v782_v11, %v781_v39  ;;  %v790_v29 = vrot.slane %v1460_v36, 1  ;;  %v1148_v49 = vld [vmem:[%s1630_s1] sm:$0xff]  }
 0x168   : > { %v738_v55 = vpack.c.b16 %v737_v51, %v737_v51  ;;  %v749_v59 = vsel %vm364_vm3, %v748_v12, %v747_v54  ;;  %v785_v63 = vsel %vm361_vm2, %v784_v1, %v783_v47  ;;  %v800_v0 = vrot.slane %v1411_v52, 7 }
 0x169   : > { %825 = vrot.lane.b32.xlu1 %v719_v40, %s1177_s26  ;;  %720 = vrot.lane.b32.xlu0 %v719_v40, %s1178_s27  ;;  %v750_v61 = vsel %vm367_vm4, %v1443_v21, %v749_v59  ;;  %v787_v39 = vsel %vm364_vm3, %v786_v24, %v785_v63  ;;  %v801_v2 = vrot.slane %v1426_v5, 6  ;;  %v803_v56 = vrot.slane %v1409_v46, 5  ;;  %v533_v12 = vpop.permute.xlu1 %532  ;;  %v438_v6 = vpop.permute.xlu0 %437 }
 0x16a   : > { %v752_v7 = vsel %vm370_vm5, %v751_v58, %v750_v61  ;;  %v789_v1 = vsel %vm367_vm4, %v788_v50, %v787_v39  ;;  %v805_v52 = vrot.slane %v1418_v62, 4  ;;  %v807_v57 = vrot.slane %v1443_v21, 3  ;;  %535 = vst.msk [vmem:[#allocation2 + $0x4] sm:$0xf] %vm440_vm11, %v533_v12  ;;  %441 = vst.msk [vmem:[#allocation2] sm:$0xf] %vm440_vm11, %v438_v6 }
 0x16b   : > { %v754_v8 = vsel %vm373_vm6, %v753_v35, %v752_v7  ;;  %v791_v5 = vsel %vm370_vm5, %v790_v29, %v789_v1  ;;  %v802_v46 = vsel %vm358_vm1, %v801_v2, %v800_v0  ;;  %v809_v9 = vrot.slane %v1460_v36, 2 }
 0x16c   : > { %v756_v30 = vsel %vm376_vm7, %v755_v45, %v754_v8  ;;  %v804_v14 = vsel %vm361_vm2, %v803_v56, %v802_v46  ;;  %v792_v62 = vsel %vm373_vm6, %v1434_v13, %v791_v5  ;;  %v793_v16 = vrot.slane %v1452_v34, 7 }
 0x16d   : > { %829 = vrot.lane.b32.xlu1 %v738_v55, %s1178_s27  ;;  %739 = vrot.lane.b32.xlu0 %v738_v55, %s1179_s28  ;;  %v806_v21 = vsel %vm364_vm3, %v805_v52, %v804_v14  ;;  %v537_v15 = vpop.permute.xlu1 %536  ;;  %v458_v48 = vpop.permute.xlu0 %457  ;;  %v757_v17 = vpack.c.b16 %v756_v30, %v756_v30  ;;  %v811_v18 = vrot.slane %v1434_v13, 1  ;;  %v1181_v13 = vmov 0.0  }
 0x16e   : > { %v808_v36 = vsel %vm367_vm4, %v807_v57, %v806_v21  ;;  %539 = vst.msk [vmem:[#allocation2 + $0x4] sm:$0xf] %vm460_vm12, %v537_v15  ;;  %461 = vst.msk [vmem:[#allocation2] sm:$0xf] %vm460_vm12, %v458_v48  ;;  %v794_v22 = vsel %vm376_vm7, %v793_v16, %v792_v62  ;;  %1102 = vmatprep.subr.bf16.mxu0 %v1181_v13  ;;  %1106 = vmatprep.mubr.msk.bf16.mxu0 %vm1183_vm15, %v1181_v13  ;;  %vm872_vm1 = vcmask 261120   ;;  %vm917_vm2 = vcmask 523264  }
 0x16f   : > { %v810_v10 = vsel %vm370_vm5, %v809_v9, %v808_v36  ;;  %543 = vst.msk [vmem:[#allocation2 + $0x4] sm:$0xf] %vm480_vm13, %v1481_v38  ;;  %481 = vst.msk [vmem:[#allocation2] sm:$0xf] %vm480_vm13, %v1474_v3  ;;  %v795_v38 = vpack.c.b16 %v794_v22, %v794_v22  ;;  %v516_v27 = vpack.c.b16 %v1405_v44, %v1405_v44 }
 0x170   : > { %v812_v43 = vsel %vm373_vm6, %v811_v18, %v810_v10 }
 0x171   : > { %758 = vrot.lane.b32.xlu1 %v757_v17, %s1175_s24  ;;  %833 = vrot.lane.b32.xlu0 %v757_v17, %s1179_s28  ;;  %v545_v24 = vpop.permute.xlu1 %544  ;;  %v498_v25 = vpop.permute.xlu0 %497  ;;  %v813_v3 = vsel %vm376_vm7, %v1452_v34, %v812_v43 }
 0x172   : > { %547 = vst.msk [vmem:[#allocation2 + $0x4] sm:$0xf] %vm500_vm14, %v545_v24  ;;  %501 = vst.msk [vmem:[#allocation2] sm:$0xf] %vm500_vm14, %v498_v25  ;;  %v814_v26 = vpack.c.b16 %v813_v3, %v813_v3 }
 0x175   : > { %841 = vrot.lane.b32.xlu1 %v795_v38, %s1174_s23  ;;  %796 = vrot.lane.b32.xlu0 %v795_v38, %s1180_s29 }
 0x179   : > { %845 = vrot.lane.b32.xlu1 %v814_v26, %s1180_s29  ;;  %815 = vrot.lane.b32.xlu0 %v814_v26, %s1182_s30 }
 0x17d   : > { %548 = vrot.lane.b32.xlu1 %v516_v27, %s1180_s29  ;;  %517 = vrot.lane.b32.xlu0 %v516_v27, %s1182_s30 }
 0x1d3   : > { %v838_v28 = vpop.permute.xlu1 %837  ;;  %v778_v32 = vpop.permute.xlu0 %777 }
 0x1d7   : > { %v702_v34 = vpop.permute.xlu1 %701  ;;  %v820_v19 = vpop.permute.xlu0 %819 }
 0x1d8   : > { %704 = vst.msk [vmem:[#allocation2 + $0x8] sm:$0xf] %vm400_vm9, %v702_v34 }
 0x1d9   : > { %822 = vst.msk [vmem:[#allocation2 + $0xc] sm:$0xf] %vm380_vm8, %v820_v19 }
 0x1da   : > { %824 = vst.msk [vmem:[#allocation2 + $0xc] sm:$0xf] %vm400_vm9, %v1511_v4 }
 0x1db   : > { %v826_v23 = vpop.permute.xlu1 %825  ;;  %v721_v60 = vpop.permute.xlu0 %720 }
 0x1dc   : > { %828 = vst.msk [vmem:[#allocation2 + $0xc] sm:$0xf] %vm420_vm10, %v826_v23  ;;  %723 = vst.msk [vmem:[#allocation2 + $0x8] sm:$0xf] %vm420_vm10, %v721_v60 }
 0x1df   : > { %v830_v44 = vpop.permute.xlu1 %829  ;;  %v740_v40 = vpop.permute.xlu0 %739 }
 0x1e0   : > { %832 = vst.msk [vmem:[#allocation2 + $0xc] sm:$0xf] %vm440_vm11, %v830_v44  ;;  %742 = vst.msk [vmem:[#allocation2 + $0x8] sm:$0xf] %vm440_vm11, %v740_v40 }
 0x1e3   : > { %v759_v20 = vpop.permute.xlu1 %758  ;;  %v834_v33 = vpop.permute.xlu0 %833 }
 0x1e4   : > { %761 = vst.msk [vmem:[#allocation2 + $0x8] sm:$0xf] %vm460_vm12, %v759_v20  ;;  %836 = vst.msk [vmem:[#allocation2 + $0xc] sm:$0xf] %vm460_vm12, %v834_v33 }
 0x1e5   : > { %780 = vst.msk [vmem:[#allocation2 + $0x8] sm:$0xf] %vm480_vm13, %v778_v32  ;;  %840 = vst.msk [vmem:[#allocation2 + $0xc] sm:$0xf] %vm480_vm13, %v838_v28 }
 0x1e7   : > { %v842_v4 = vpop.permute.xlu1 %841  ;;  %v797_v31 = vpop.permute.xlu0 %796 }
 0x1e8   : > { %844 = vst.msk [vmem:[#allocation2 + $0xc] sm:$0xf] %vm500_vm14, %v842_v4  ;;  %799 = vst.msk [vmem:[#allocation2 + $0x8] sm:$0xf] %vm500_vm14, %v797_v31 }
 0x1eb   : > { %v846_v53 = vpop.permute.xlu1 %845  ;;  %v816_v58 = vpop.permute.xlu0 %815 }
 0x1ec   : > { %848 = vst.msk [vmem:[#allocation2 + $0xc] sm:$0xf] %vm520_vm0, %v846_v53  ;;  %818 = vst.msk [vmem:[#allocation2 + $0x8] sm:$0xf] %vm520_vm0, %v816_v58 }
 0x1ef   : > { %v549_v35 = vpop.permute.xlu1 %548  ;;  %v518_v11 = vpop.permute.xlu0 %517 }
 0x1f0   : > { %551 = vst.msk [vmem:[#allocation2 + $0x4] sm:$0xf] %vm520_vm0, %v549_v35  ;;  %521 = vst.msk [vmem:[#allocation2] sm:$0xf] %vm520_vm0, %v518_v11 }
 0x1f3   : > { %v1146_v41 = vld [vmem:[#allocation2 + $0x8] sm:$0xff]  }
 0x1f4   : > { %1103 = vmatpush3.bf16.msra.mxu0 %v1146_v41 }
 0x1f5   : > { %1104 = vmatprep.subr.bf16.mxu0 %v1181_v13 }
 0x1f7   : > { %v1147_v42 = vld [vmem:[#allocation2] sm:$0xff]  }
 0x1f8   : > { %1105 = vmatpush3.bf16.msra.mxu0 %v1147_v42 }
 0x1fb   : > { %1107 = vmatmul.mubr.msk.bf16.vlgmr.msra.gmra.mxu0 %vm872_vm1, %v1148_v49 }
 0x2bb   : > { %v910_v37 = vpop.f32.mrf.mxu0 }
 0x2bc   : > { %918 = vst.msk [vmem:[%s201_s9] sm:$0xff] %vm917_vm2, %v910_v37 }
 0x2bd   : > { %v1108_v45 = vpop.f32.mrf.mxu0 }
 0x2bf   : > { %v913_v50 = vpop.f32.mrf.mxu0 }
 0x2c0   : > { %919 = vst.msk [vmem:[%s201_s9 + $0x8] sm:$0xff] %vm917_vm2, %v913_v50 }
 0x2c1   : > { %v1109_v51 = vpop.f32.mrf.mxu0 }
 0x2c2 PF: > { %s13_s14 = sadd.s32 1, %s1171_s14   ;;  %s1633_s12 = smov %s1167_s13 }
 0x2c3   : > { %p10_p5 = scmp.ge.s32.totalorder %s13_s14, 4   ;;  %s1634_s13 = smov %s1636_s15 }
 0x2c5   :  { %12 = sbr.rel (!%p10_p5) target bundleno = 2 (0x2), region = 62 }

</bundles_post_ra>
